<compile_context>
chip_gen: v7x
topology: tpu7x:2x2x1
jax: 0.10.0
libtpu: 0.0.40
codegen_flags: <defaults>
</compile_context>

<pallas_src>
import math
import functools

import jax
import jax.numpy as jnp
from jax.experimental import pallas as pl
from jax.experimental.pallas import tpu as pltpu

# ----------------------------- model sizes --------------------------------
EMBED = 32          # embed_size
HEADS = 4           # heads
HEAD_DIM = EMBED // HEADS
SEQ = 8             # sequence length L
BATCH = 2           # batch N
EPS = 1e-5          # nn.LayerNorm default eps

# rows inside the packed bias / LayerNorm parameter slab
_BQ, _BK, _BV, _BO, _B1, _B2, _G1, _BE1, _G2, _BE2 = range(10)
PARAM_ROWS = 16     # padded to a sublane multiple


# ------------------------------- kernel -----------------------------------
def _layer_norm(x, gamma, beta):
    mean = jnp.mean(x, axis=-1, keepdims=True)
    var = jnp.mean((x - mean) ** 2, axis=-1, keepdims=True)   # biased, like PyTorch
    return (x - mean) * jax.lax.rsqrt(var + EPS) * gamma + beta


def _transformer_block_kernel(q_ref, k_ref, v_ref, w_ref, p_ref, out_ref,
                              *, batch, seq, heads, head_dim):
    embed = heads * head_dim
    nl = batch * seq

    q_in = q_ref[...].astype(jnp.float32)      # (NL, E), seq-major rows (l*N + n)
    k_in = k_ref[...].astype(jnp.float32)
    v_in = v_ref[...].astype(jnp.float32)
    w = w_ref[...].astype(jnp.float32)         # (6E, E): pre-transposed weights
    p = p_ref[...].astype(jnp.float32)         # (PARAM_ROWS, E): biases + LN params

    wq_t = w[0 * embed:1 * embed, :]           # sublane slices (cheap, aligned)
    wk_t = w[1 * embed:2 * embed, :]
    wv_t = w[2 * embed:3 * embed, :]
    wo_t = w[3 * embed:4 * embed, :]
    w1_t = w[4 * embed:5 * embed, :]
    w2_t = w[5 * embed:6 * embed, :]

    def prow(i):
        return p[i:i + 1, :]                   # (1, E) broadcast row

    def mm(a, b):                              # bf16 MXU matmul, f32 accumulate
        return jnp.dot(a.astype(jnp.bfloat16), b.astype(jnp.bfloat16),
                       preferred_element_type=jnp.float32)

    # ---- input projections: x @ W^T + b (W^T, and the 1/sqrt(hd) scale on
    #      Wq^T / bq, are pre-computed once at pack time) ----
    qp = mm(q_in, wq_t) + prow(_BQ)
    kp = mm(k_in, wk_t) + prow(_BK)
    vp = mm(v_in, wv_t) + prow(_BV)

    # Batch handled by masking: row r of the (NL, E) slab belongs to batch
    # r % N, so cross-batch score entries are masked to -inf before softmax.
    rid = jax.lax.broadcasted_iota(jnp.int32, (nl, nl), 0)
    cid = jax.lax.broadcasted_iota(jnp.int32, (nl, nl), 1)
    same_batch = (rid % batch) == (cid % batch)
    neg_inf = jnp.float32(-1e30)

    # ---- per-head attention: pure 2-D matmuls, independent Wo partials ----
    partials = []
    for h in range(heads):                     # static unrolled loop
        sl = slice(h * head_dim, (h + 1) * head_dim)
        qh = qp[:, sl].astype(jnp.bfloat16)    # (NL, hd) lane slices
        kh = kp[:, sl].astype(jnp.bfloat16)
        vh = vp[:, sl].astype(jnp.bfloat16)

        # scores over all NL rows at once; cross-batch entries masked out
        s = jax.lax.dot_general(qh, kh, (((1,), (1,)), ((), ())),
                                preferred_element_type=jnp.float32)  # (NL, NL)
        s = jnp.where(same_batch, s, neg_inf)
        s = s - jnp.max(s, axis=-1, keepdims=True)
        e = jnp.exp(s)
        pr = e / jnp.sum(e, axis=-1, keepdims=True)   # exact reciprocal

        oh = jnp.dot(pr.astype(jnp.bfloat16), vh,
                     preferred_element_type=jnp.float32)             # (NL, hd)
        partials.append(
            jnp.dot(oh.astype(jnp.bfloat16), wo_t[sl, :].astype(jnp.bfloat16),
                    preferred_element_type=jnp.float32))             # (NL, E)

    # tree-sum of independent per-head Wo partials (no serial MRF chain)
    while len(partials) > 1:
        nxt = [partials[i] + partials[i + 1]
               for i in range(0, len(partials) - 1, 2)]
        if len(partials) % 2:
            nxt.append(partials[-1])
        partials = nxt
    attn = partials[0] + prow(_BO)

    # ---- residual + norm1 ----
    x1 = _layer_norm(attn + q_in, prow(_G1), prow(_BE1))

    # ---- feed-forward: Linear -> ReLU -> Linear ----
    h1 = jnp.maximum(mm(x1, w1_t) + prow(_B1), 0.0)
    ff = mm(h1, w2_t) + prow(_B2)

    # ---- residual + norm2 ----
    out = _layer_norm(ff + x1, prow(_G2), prow(_BE2))
    out_ref[...] = out.astype(out_ref.dtype)


# ------------------------------- wrapper -----------------------------------
def pack_params(params):
    """Pack all 18 parameter tensors into 2 slabs.  Call ONCE at init."""
    scale = 1.0 / math.sqrt(HEAD_DIM)
    # pre-transpose all weights (no in-kernel .T) and fold the softmax scale
    # into Wq^T / bq
    w_slab = jnp.concatenate(
        [params["wq"].T * scale, params["wk"].T, params["wv"].T,
         params["wo"].T, params["w1"].T, params["w2"].T], axis=0)    # (6E, E)
    rows = jnp.concatenate(
        [params["bq"] * scale, params["bk"], params["bv"], params["bo"],
         params["b1"], params["b2"], params["g1"], params["be1"],
         params["g2"], params["be2"]], axis=0)                       # (10, E)
    p_slab = jnp.concatenate(
        [rows, jnp.zeros((PARAM_ROWS - rows.shape[0], EMBED), rows.dtype)],
        axis=0)                                                      # (16, E)
    return w_slab, p_slab


@jax.jit
def transformer_block(query, key, value, w_slab, p_slab):
    """query/key/value: (L, N, E) — PyTorch MultiheadAttention default layout."""
    L, N, E = query.shape
    nl = N * L

    # free, layout-preserving reshapes (seq-major rows): no transposes dispatched
    q2 = query.reshape(nl, E)
    k2 = key.reshape(nl, E)
    v2 = value.reshape(nl, E)

    kernel = functools.partial(
        _transformer_block_kernel,
        batch=N, seq=L, heads=HEADS, head_dim=HEAD_DIM)

    out_flat = pl.pallas_call(
        kernel,
        out_shape=jax.ShapeDtypeStruct((nl, E), query.dtype),
        grid_spec=pltpu.PrefetchScalarGridSpec(
            num_scalar_prefetch=0,
            grid=(1,),                                    # single grid step
            in_specs=[
                pl.BlockSpec((nl, E), lambda i: (0, 0)),           # query rows
                pl.BlockSpec((nl, E), lambda i: (0, 0)),           # key rows
                pl.BlockSpec((nl, E), lambda i: (0, 0)),           # value rows
                pl.BlockSpec((6 * E, E), lambda i: (0, 0)),        # weight slab
                pl.BlockSpec((PARAM_ROWS, E), lambda i: (0, 0)),   # bias/LN slab
            ],
            out_specs=pl.BlockSpec((nl, E), lambda i: (0, 0)),
        ),
        compiler_params=pltpu.CompilerParams(
            dimension_semantics=("arbitrary",)),
    )(q2, k2, v2, w_slab, p_slab)

    # (N*L, E) seq-major -> (L, N, E): free reshape, no transpose
    return out_flat.reshape(L, N, E)


# --------------------------- pure-JAX reference -----------------------------
def transformer_block_ref(query, key, value, p):
    def proj(x, w, b):
        return x @ w.T + b[0]

    def layer_norm(x, g, b):
        mean = jnp.mean(x, axis=-1, keepdims=True)
        var = jnp.mean((x - mean) ** 2, axis=-1, keepdims=True)
        return (x - mean) / jnp.sqrt(var + EPS) * g[0] + b[0]

    L, N, E = query.shape
    q = proj(query, p["wq"], p["bq"])
    k = proj(key, p["wk"], p["bk"])
    v = proj(value, p["wv"], p["bv"])

    def split_heads(x):
        return jnp.transpose(
            x.reshape(L, N, HEADS, HEAD_DIM), (1, 2, 0, 3)
        ).reshape(N * HEADS, L, HEAD_DIM)

    qh, kh, vh = split_heads(q), split_heads(k), split_heads(v)
    s = jnp.einsum("bld,bmd->blm", qh, kh) / math.sqrt(HEAD_DIM)
    pw = jax.nn.softmax(s, axis=-1)
    o = jnp.einsum("blm,bmd->bld", pw, vh)                      # (N*H, L, hd)
    o = o.reshape(N, HEADS, L, HEAD_DIM).transpose(2, 0, 1, 3).reshape(L, N, E)
    attn = proj(o, p["wo"], p["bo"])
    x = layer_norm(attn + query, p["g1"], p["be1"])
    ff = proj(jnp.maximum(proj(x, p["w1"], p["b1"]), 0.0), p["w2"], p["b2"])
    return layer_norm(ff + x, p["g2"], p["be2"])


# ------------------------------- main --------------------------------------
if __name__ == "__main__":
    key = jax.random.PRNGKey(0)
    keys = jax.random.split(key, 16)

    scale = 0.05
    params = {
        "wq": scale * jax.random.normal(keys[0], (EMBED, EMBED), jnp.float32),
        "wk": scale * jax.random.normal(keys[1], (EMBED, EMBED), jnp.float32),
        "wv": scale * jax.random.normal(keys[2], (EMBED, EMBED), jnp.float32),
        "bq": scale * jax.random.normal(keys[3], (1, EMBED), jnp.float32),
        "bk": scale * jax.random.normal(keys[4], (1, EMBED), jnp.float32),
        "bv": scale * jax.random.normal(keys[5], (1, EMBED), jnp.float32),
        "wo": scale * jax.random.normal(keys[6], (EMBED, EMBED), jnp.float32),
        "bo": scale * jax.random.normal(keys[7], (1, EMBED), jnp.float32),
        "w1": scale * jax.random.normal(keys[8], (EMBED, EMBED), jnp.float32),
        "b1": scale * jax.random.normal(keys[9], (1, EMBED), jnp.float32),
        "w2": scale * jax.random.normal(keys[10], (EMBED, EMBED), jnp.float32),
        "b2": scale * jax.random.normal(keys[11], (1, EMBED), jnp.float32),
        "g1": jnp.ones((1, EMBED), jnp.float32),
        "be1": jnp.zeros((1, EMBED), jnp.float32),
        "g2": jnp.ones((1, EMBED), jnp.float32),
        "be2": jnp.zeros((1, EMBED), jnp.float32),
    }

    # Inputs in PyTorch MultiheadAttention default layout: (L, N, E)
    value = jax.random.normal(keys[12], (SEQ, BATCH, EMBED), jnp.float32)
    k_in = jax.random.normal(keys[13], (SEQ, BATCH, EMBED), jnp.float32)
    query = jax.random.normal(keys[14], (SEQ, BATCH, EMBED), jnp.float32)

    # parameter packing done ONCE at init (not on the per-call path)
    w_slab, p_slab = pack_params(params)
    w_slab = jax.block_until_ready(w_slab)
    p_slab = jax.block_until_ready(p_slab)

    out = transformer_block(query, k_in, value, w_slab, p_slab)
    out = jax.block_until_ready(out)

    ref = transformer_block_ref(query, k_in, value, params)
    assert out.shape == (SEQ, BATCH, EMBED)
    # tolerance reflects bf16 MXU operands (f32 accumulate); the softmax
    # reciprocal itself is now exact.
    err = jnp.max(jnp.abs(out - ref))
    assert jnp.allclose(out, ref, atol=1e-2, rtol=1e-2), f"max abs err = {err}"

    print("KERNEL_OK")
</pallas_src>

<mosaic_0001>
module attributes {stable_mosaic.version = 11 : i64} {
  func.func @_transformer_block_kernel(%arg0: i32, %arg1: memref<16x32xf32, #tpu.memory_space<vmem>>, %arg2: memref<16x32xf32, #tpu.memory_space<vmem>>, %arg3: memref<16x32xf32, #tpu.memory_space<vmem>>, %arg4: memref<192x32xf32, #tpu.memory_space<vmem>>, %arg5: memref<16x32xf32, #tpu.memory_space<vmem>>, %arg6: memref<16x32xf32, #tpu.memory_space<vmem>>) attributes {dimension_semantics = [#tpu.dimension_semantics<arbitrary>], iteration_bounds = array<i64: 1>, scalar_prefetch = 0 : i64, scratch_operands = 0 : i64, tpu.core_type = #tpu.core_type<tc>, window_params = [{pipeline_mode = #tpu.pipeline_mode<synchronous>, transform_indices = @transform_0, window_bounds = array<i64: 16, 32>}, {pipeline_mode = #tpu.pipeline_mode<synchronous>, transform_indices = @transform_1, window_bounds = array<i64: 16, 32>}, {pipeline_mode = #tpu.pipeline_mode<synchronous>, transform_indices = @transform_2, window_bounds = array<i64: 16, 32>}, {pipeline_mode = #tpu.pipeline_mode<synchronous>, transform_indices = @transform_3, window_bounds = array<i64: 192, 32>}, {pipeline_mode = #tpu.pipeline_mode<synchronous>, transform_indices = @transform_4, window_bounds = array<i64: 16, 32>}, {pipeline_mode = #tpu.pipeline_mode<synchronous>, transform_indices = @transform_5, window_bounds = array<i64: 16, 32>}]} {
    %c0 = arith.constant 0 : index
    %c0_0 = arith.constant 0 : index
    %0 = vector.load %arg1[%c0, %c0_0] : memref<16x32xf32, #tpu.memory_space<vmem>>, vector<16x32xf32>
    %c0_1 = arith.constant 0 : index
    %c0_2 = arith.constant 0 : index
    %1 = vector.load %arg2[%c0_1, %c0_2] : memref<16x32xf32, #tpu.memory_space<vmem>>, vector<16x32xf32>
    %c0_3 = arith.constant 0 : index
    %c0_4 = arith.constant 0 : index
    %2 = vector.load %arg3[%c0_3, %c0_4] : memref<16x32xf32, #tpu.memory_space<vmem>>, vector<16x32xf32>
    %c0_5 = arith.constant 0 : index
    %c0_6 = arith.constant 0 : index
    %3 = vector.load %arg4[%c0_5, %c0_6] : memref<192x32xf32, #tpu.memory_space<vmem>>, vector<192x32xf32>
    %c0_7 = arith.constant 0 : index
    %c0_8 = arith.constant 0 : index
    %4 = vector.load %arg5[%c0_7, %c0_8] : memref<16x32xf32, #tpu.memory_space<vmem>>, vector<16x32xf32>
    %5 = vector.extract_strided_slice %3 {offsets = [0, 0], sizes = [32, 32], strides = [1, 1]} : vector<192x32xf32> to vector<32x32xf32>
    %6 = vector.extract_strided_slice %3 {offsets = [32, 0], sizes = [32, 32], strides = [1, 1]} : vector<192x32xf32> to vector<32x32xf32>
    %7 = vector.extract_strided_slice %3 {offsets = [64, 0], sizes = [32, 32], strides = [1, 1]} : vector<192x32xf32> to vector<32x32xf32>
    %8 = vector.extract_strided_slice %3 {offsets = [96, 0], sizes = [32, 32], strides = [1, 1]} : vector<192x32xf32> to vector<32x32xf32>
    %9 = vector.extract_strided_slice %3 {offsets = [128, 0], sizes = [32, 32], strides = [1, 1]} : vector<192x32xf32> to vector<32x32xf32>
    %10 = vector.extract_strided_slice %3 {offsets = [160, 0], sizes = [32, 32], strides = [1, 1]} : vector<192x32xf32> to vector<32x32xf32>
    %11 = arith.truncf %0 : vector<16x32xf32> to vector<16x32xbf16>
    %12 = arith.truncf %5 : vector<32x32xf32> to vector<32x32xbf16>
    %cst = arith.constant dense<0.000000e+00> : vector<16x32xf32>
    %13 = tpu.matmul %11, %12, %cst {dimension_numbers = #tpu.dot_dimension_numbers<[1], [0], [0], [1], [0, 0, 1, 1], [], []>} : vector<16x32xbf16>, vector<32x32xbf16>, vector<16x32xf32> -> vector<16x32xf32>
    %14 = vector.extract_strided_slice %4 {offsets = [0, 0], sizes = [1, 32], strides = [1, 1]} : vector<16x32xf32> to vector<1x32xf32>
    %15 = vector.broadcast %14 : vector<1x32xf32> to vector<16x32xf32>
    %16 = arith.addf %13, %15 : vector<16x32xf32>
    %17 = arith.truncf %1 : vector<16x32xf32> to vector<16x32xbf16>
    %18 = arith.truncf %6 : vector<32x32xf32> to vector<32x32xbf16>
    %cst_9 = arith.constant dense<0.000000e+00> : vector<16x32xf32>
    %19 = tpu.matmul %17, %18, %cst_9 {dimension_numbers = #tpu.dot_dimension_numbers<[1], [0], [0], [1], [0, 0, 1, 1], [], []>} : vector<16x32xbf16>, vector<32x32xbf16>, vector<16x32xf32> -> vector<16x32xf32>
    %20 = vector.extract_strided_slice %4 {offsets = [1, 0], sizes = [1, 32], strides = [1, 1]} : vector<16x32xf32> to vector<1x32xf32>
    %21 = vector.broadcast %20 : vector<1x32xf32> to vector<16x32xf32>
    %22 = arith.addf %19, %21 : vector<16x32xf32>
    %23 = arith.truncf %2 : vector<16x32xf32> to vector<16x32xbf16>
    %24 = arith.truncf %7 : vector<32x32xf32> to vector<32x32xbf16>
    %cst_10 = arith.constant dense<0.000000e+00> : vector<16x32xf32>
    %25 = tpu.matmul %23, %24, %cst_10 {dimension_numbers = #tpu.dot_dimension_numbers<[1], [0], [0], [1], [0, 0, 1, 1], [], []>} : vector<16x32xbf16>, vector<32x32xbf16>, vector<16x32xf32> -> vector<16x32xf32>
    %26 = vector.extract_strided_slice %4 {offsets = [2, 0], sizes = [1, 32], strides = [1, 1]} : vector<16x32xf32> to vector<1x32xf32>
    %27 = vector.broadcast %26 : vector<1x32xf32> to vector<16x32xf32>
    %28 = arith.addf %25, %27 : vector<16x32xf32>
    %29 = tpu.iota {dimensions = array<i32: 0>} : vector<16x16xi32>
    %30 = tpu.iota {dimensions = array<i32: 1>} : vector<16x16xi32>
    %c2_i32 = arith.constant 2 : i32
    %c0_i32 = arith.constant 0 : i32
    %31 = arith.cmpi eq, %c2_i32, %c0_i32 : i32
    %c1_i32 = arith.constant 1 : i32
    %32 = arith.select %31, %c1_i32, %c2_i32 : i32
    %33 = vector.broadcast %32 : i32 to vector<16x16xi32>
    %34 = arith.remsi %29, %33 : vector<16x16xi32>
    %c0_i32_11 = arith.constant 0 : i32
    %35 = vector.broadcast %c0_i32_11 : i32 to vector<16x16xi32>
    %36 = arith.cmpi ne, %34, %35 : vector<16x16xi32>
    %c0_i32_12 = arith.constant 0 : i32
    %37 = vector.broadcast %c0_i32_12 : i32 to vector<16x16xi32>
    %38 = arith.cmpi slt, %34, %37 : vector<16x16xi32>
    %c0_i32_13 = arith.constant 0 : i32
    %39 = arith.cmpi slt, %32, %c0_i32_13 : i32
    %40 = vector.broadcast %39 : i1 to vector<16x16xi1>
    %41 = vector.broadcast %40 : vector<16x16xi1> to vector<16x16xi1>
    %42 = arith.xori %38, %41 : vector<16x16xi1>
    %43 = arith.andi %42, %36 : vector<16x16xi1>
    %44 = vector.broadcast %32 : i32 to vector<16x16xi32>
    %45 = arith.addi %34, %44 : vector<16x16xi32>
    %46 = arith.select %43, %45, %34 : vector<16x16xi1>, vector<16x16xi32>
    %c2_i32_14 = arith.constant 2 : i32
    %c0_i32_15 = arith.constant 0 : i32
    %47 = arith.cmpi eq, %c2_i32_14, %c0_i32_15 : i32
    %c1_i32_16 = arith.constant 1 : i32
    %48 = arith.select %47, %c1_i32_16, %c2_i32_14 : i32
    %49 = vector.broadcast %48 : i32 to vector<16x16xi32>
    %50 = arith.remsi %30, %49 : vector<16x16xi32>
    %c0_i32_17 = arith.constant 0 : i32
    %51 = vector.broadcast %c0_i32_17 : i32 to vector<16x16xi32>
    %52 = arith.cmpi ne, %50, %51 : vector<16x16xi32>
    %c0_i32_18 = arith.constant 0 : i32
    %53 = vector.broadcast %c0_i32_18 : i32 to vector<16x16xi32>
    %54 = arith.cmpi slt, %50, %53 : vector<16x16xi32>
    %c0_i32_19 = arith.constant 0 : i32
    %55 = arith.cmpi slt, %48, %c0_i32_19 : i32
    %56 = vector.broadcast %55 : i1 to vector<16x16xi1>
    %57 = vector.broadcast %56 : vector<16x16xi1> to vector<16x16xi1>
    %58 = arith.xori %54, %57 : vector<16x16xi1>
    %59 = arith.andi %58, %52 : vector<16x16xi1>
    %60 = vector.broadcast %48 : i32 to vector<16x16xi32>
    %61 = arith.addi %50, %60 : vector<16x16xi32>
    %62 = arith.select %59, %61, %50 : vector<16x16xi1>, vector<16x16xi32>
    %63 = arith.cmpi eq, %46, %62 : vector<16x16xi32>
    %64 = vector.extract_strided_slice %16 {offsets = [0, 0], sizes = [16, 8], strides = [1, 1]} : vector<16x32xf32> to vector<16x8xf32>
    %65 = arith.truncf %64 : vector<16x8xf32> to vector<16x8xbf16>
    %66 = vector.extract_strided_slice %22 {offsets = [0, 0], sizes = [16, 8], strides = [1, 1]} : vector<16x32xf32> to vector<16x8xf32>
    %67 = arith.truncf %66 : vector<16x8xf32> to vector<16x8xbf16>
    %68 = vector.extract_strided_slice %28 {offsets = [0, 0], sizes = [16, 8], strides = [1, 1]} : vector<16x32xf32> to vector<16x8xf32>
    %69 = arith.truncf %68 : vector<16x8xf32> to vector<16x8xbf16>
    %cst_20 = arith.constant dense<0.000000e+00> : vector<16x16xf32>
    %70 = tpu.matmul %65, %67, %cst_20 {dimension_numbers = #tpu.dot_dimension_numbers<[1], [1], [0], [0], [0, 0, 1, 0], [], []>} : vector<16x8xbf16>, vector<16x8xbf16>, vector<16x16xf32> -> vector<16x16xf32>
    %cst_21 = arith.constant -1.000000e+30 : f32
    %71 = vector.broadcast %cst_21 : f32 to vector<16x16xf32>
    %72 = arith.select %63, %70, %71 : vector<16x16xi1>, vector<16x16xf32>
    %cst_22 = arith.constant dense<0xFF800000> : vector<16xf32>
    %73 = vector.multi_reduction <maximumf>, %72, %cst_22 [1] : vector<16x16xf32> to vector<16xf32>
    %74 = vector.shape_cast %73 : vector<16xf32> to vector<16x1xf32>
    %75 = vector.broadcast %74 : vector<16x1xf32> to vector<16x16xf32>
    %76 = arith.subf %72, %75 : vector<16x16xf32>
    %77 = math.exp %76 : vector<16x16xf32>
    %cst_23 = arith.constant dense<0.000000e+00> : vector<16xf32>
    %78 = vector.multi_reduction <add>, %77, %cst_23 [1] : vector<16x16xf32> to vector<16xf32>
    %79 = vector.shape_cast %78 : vector<16xf32> to vector<16x1xf32>
    %80 = vector.broadcast %79 : vector<16x1xf32> to vector<16x16xf32>
    %81 = arith.divf %77, %80 : vector<16x16xf32>
    %82 = arith.truncf %81 : vector<16x16xf32> to vector<16x16xbf16>
    %cst_24 = arith.constant dense<0.000000e+00> : vector<16x8xf32>
    %83 = tpu.matmul %82, %69, %cst_24 {dimension_numbers = #tpu.dot_dimension_numbers<[1], [0], [0], [1], [0, 0, 1, 1], [], []>} : vector<16x16xbf16>, vector<16x8xbf16>, vector<16x8xf32> -> vector<16x8xf32>
    %84 = arith.truncf %83 : vector<16x8xf32> to vector<16x8xbf16>
    %85 = vector.extract_strided_slice %8 {offsets = [0, 0], sizes = [8, 32], strides = [1, 1]} : vector<32x32xf32> to vector<8x32xf32>
    %86 = arith.truncf %85 : vector<8x32xf32> to vector<8x32xbf16>
    %cst_25 = arith.constant dense<0.000000e+00> : vector<16x32xf32>
    %87 = tpu.matmul %84, %86, %cst_25 {dimension_numbers = #tpu.dot_dimension_numbers<[1], [0], [0], [1], [0, 0, 1, 1], [], []>} : vector<16x8xbf16>, vector<8x32xbf16>, vector<16x32xf32> -> vector<16x32xf32>
    %88 = vector.extract_strided_slice %16 {offsets = [0, 8], sizes = [16, 8], strides = [1, 1]} : vector<16x32xf32> to vector<16x8xf32>
    %89 = arith.truncf %88 : vector<16x8xf32> to vector<16x8xbf16>
    %90 = vector.extract_strided_slice %22 {offsets = [0, 8], sizes = [16, 8], strides = [1, 1]} : vector<16x32xf32> to vector<16x8xf32>
    %91 = arith.truncf %90 : vector<16x8xf32> to vector<16x8xbf16>
    %92 = vector.extract_strided_slice %28 {offsets = [0, 8], sizes = [16, 8], strides = [1, 1]} : vector<16x32xf32> to vector<16x8xf32>
    %93 = arith.truncf %92 : vector<16x8xf32> to vector<16x8xbf16>
    %cst_26 = arith.constant dense<0.000000e+00> : vector<16x16xf32>
    %94 = tpu.matmul %89, %91, %cst_26 {dimension_numbers = #tpu.dot_dimension_numbers<[1], [1], [0], [0], [0, 0, 1, 0], [], []>} : vector<16x8xbf16>, vector<16x8xbf16>, vector<16x16xf32> -> vector<16x16xf32>
    %cst_27 = arith.constant -1.000000e+30 : f32
    %95 = vector.broadcast %cst_27 : f32 to vector<16x16xf32>
    %96 = arith.select %63, %94, %95 : vector<16x16xi1>, vector<16x16xf32>
    %cst_28 = arith.constant dense<0xFF800000> : vector<16xf32>
    %97 = vector.multi_reduction <maximumf>, %96, %cst_28 [1] : vector<16x16xf32> to vector<16xf32>
    %98 = vector.shape_cast %97 : vector<16xf32> to vector<16x1xf32>
    %99 = vector.broadcast %98 : vector<16x1xf32> to vector<16x16xf32>
    %100 = arith.subf %96, %99 : vector<16x16xf32>
    %101 = math.exp %100 : vector<16x16xf32>
    %cst_29 = arith.constant dense<0.000000e+00> : vector<16xf32>
    %102 = vector.multi_reduction <add>, %101, %cst_29 [1] : vector<16x16xf32> to vector<16xf32>
    %103 = vector.shape_cast %102 : vector<16xf32> to vector<16x1xf32>
    %104 = vector.broadcast %103 : vector<16x1xf32> to vector<16x16xf32>
    %105 = arith.divf %101, %104 : vector<16x16xf32>
    %106 = arith.truncf %105 : vector<16x16xf32> to vector<16x16xbf16>
    %cst_30 = arith.constant dense<0.000000e+00> : vector<16x8xf32>
    %107 = tpu.matmul %106, %93, %cst_30 {dimension_numbers = #tpu.dot_dimension_numbers<[1], [0], [0], [1], [0, 0, 1, 1], [], []>} : vector<16x16xbf16>, vector<16x8xbf16>, vector<16x8xf32> -> vector<16x8xf32>
    %108 = arith.truncf %107 : vector<16x8xf32> to vector<16x8xbf16>
    %109 = vector.extract_strided_slice %8 {offsets = [8, 0], sizes = [8, 32], strides = [1, 1]} : vector<32x32xf32> to vector<8x32xf32>
    %110 = arith.truncf %109 : vector<8x32xf32> to vector<8x32xbf16>
    %cst_31 = arith.constant dense<0.000000e+00> : vector<16x32xf32>
    %111 = tpu.matmul %108, %110, %cst_31 {dimension_numbers = #tpu.dot_dimension_numbers<[1], [0], [0], [1], [0, 0, 1, 1], [], []>} : vector<16x8xbf16>, vector<8x32xbf16>, vector<16x32xf32> -> vector<16x32xf32>
    %112 = vector.extract_strided_slice %16 {offsets = [0, 16], sizes = [16, 8], strides = [1, 1]} : vector<16x32xf32> to vector<16x8xf32>
    %113 = arith.truncf %112 : vector<16x8xf32> to vector<16x8xbf16>
    %114 = vector.extract_strided_slice %22 {offsets = [0, 16], sizes = [16, 8], strides = [1, 1]} : vector<16x32xf32> to vector<16x8xf32>
    %115 = arith.truncf %114 : vector<16x8xf32> to vector<16x8xbf16>
    %116 = vector.extract_strided_slice %28 {offsets = [0, 16], sizes = [16, 8], strides = [1, 1]} : vector<16x32xf32> to vector<16x8xf32>
    %117 = arith.truncf %116 : vector<16x8xf32> to vector<16x8xbf16>
    %cst_32 = arith.constant dense<0.000000e+00> : vector<16x16xf32>
    %118 = tpu.matmul %113, %115, %cst_32 {dimension_numbers = #tpu.dot_dimension_numbers<[1], [1], [0], [0], [0, 0, 1, 0], [], []>} : vector<16x8xbf16>, vector<16x8xbf16>, vector<16x16xf32> -> vector<16x16xf32>
    %cst_33 = arith.constant -1.000000e+30 : f32
    %119 = vector.broadcast %cst_33 : f32 to vector<16x16xf32>
    %120 = arith.select %63, %118, %119 : vector<16x16xi1>, vector<16x16xf32>
    %cst_34 = arith.constant dense<0xFF800000> : vector<16xf32>
    %121 = vector.multi_reduction <maximumf>, %120, %cst_34 [1] : vector<16x16xf32> to vector<16xf32>
    %122 = vector.shape_cast %121 : vector<16xf32> to vector<16x1xf32>
    %123 = vector.broadcast %122 : vector<16x1xf32> to vector<16x16xf32>
    %124 = arith.subf %120, %123 : vector<16x16xf32>
    %125 = math.exp %124 : vector<16x16xf32>
    %cst_35 = arith.constant dense<0.000000e+00> : vector<16xf32>
    %126 = vector.multi_reduction <add>, %125, %cst_35 [1] : vector<16x16xf32> to vector<16xf32>
    %127 = vector.shape_cast %126 : vector<16xf32> to vector<16x1xf32>
    %128 = vector.broadcast %127 : vector<16x1xf32> to vector<16x16xf32>
    %129 = arith.divf %125, %128 : vector<16x16xf32>
    %130 = arith.truncf %129 : vector<16x16xf32> to vector<16x16xbf16>
    %cst_36 = arith.constant dense<0.000000e+00> : vector<16x8xf32>
    %131 = tpu.matmul %130, %117, %cst_36 {dimension_numbers = #tpu.dot_dimension_numbers<[1], [0], [0], [1], [0, 0, 1, 1], [], []>} : vector<16x16xbf16>, vector<16x8xbf16>, vector<16x8xf32> -> vector<16x8xf32>
    %132 = arith.truncf %131 : vector<16x8xf32> to vector<16x8xbf16>
    %133 = vector.extract_strided_slice %8 {offsets = [16, 0], sizes = [8, 32], strides = [1, 1]} : vector<32x32xf32> to vector<8x32xf32>
    %134 = arith.truncf %133 : vector<8x32xf32> to vector<8x32xbf16>
    %cst_37 = arith.constant dense<0.000000e+00> : vector<16x32xf32>
    %135 = tpu.matmul %132, %134, %cst_37 {dimension_numbers = #tpu.dot_dimension_numbers<[1], [0], [0], [1], [0, 0, 1, 1], [], []>} : vector<16x8xbf16>, vector<8x32xbf16>, vector<16x32xf32> -> vector<16x32xf32>
    %136 = vector.extract_strided_slice %16 {offsets = [0, 24], sizes = [16, 8], strides = [1, 1]} : vector<16x32xf32> to vector<16x8xf32>
    %137 = arith.truncf %136 : vector<16x8xf32> to vector<16x8xbf16>
    %138 = vector.extract_strided_slice %22 {offsets = [0, 24], sizes = [16, 8], strides = [1, 1]} : vector<16x32xf32> to vector<16x8xf32>
    %139 = arith.truncf %138 : vector<16x8xf32> to vector<16x8xbf16>
    %140 = vector.extract_strided_slice %28 {offsets = [0, 24], sizes = [16, 8], strides = [1, 1]} : vector<16x32xf32> to vector<16x8xf32>
    %141 = arith.truncf %140 : vector<16x8xf32> to vector<16x8xbf16>
    %cst_38 = arith.constant dense<0.000000e+00> : vector<16x16xf32>
    %142 = tpu.matmul %137, %139, %cst_38 {dimension_numbers = #tpu.dot_dimension_numbers<[1], [1], [0], [0], [0, 0, 1, 0], [], []>} : vector<16x8xbf16>, vector<16x8xbf16>, vector<16x16xf32> -> vector<16x16xf32>
    %cst_39 = arith.constant -1.000000e+30 : f32
    %143 = vector.broadcast %cst_39 : f32 to vector<16x16xf32>
    %144 = arith.select %63, %142, %143 : vector<16x16xi1>, vector<16x16xf32>
    %cst_40 = arith.constant dense<0xFF800000> : vector<16xf32>
    %145 = vector.multi_reduction <maximumf>, %144, %cst_40 [1] : vector<16x16xf32> to vector<16xf32>
    %146 = vector.shape_cast %145 : vector<16xf32> to vector<16x1xf32>
    %147 = vector.broadcast %146 : vector<16x1xf32> to vector<16x16xf32>
    %148 = arith.subf %144, %147 : vector<16x16xf32>
    %149 = math.exp %148 : vector<16x16xf32>
    %cst_41 = arith.constant dense<0.000000e+00> : vector<16xf32>
    %150 = vector.multi_reduction <add>, %149, %cst_41 [1] : vector<16x16xf32> to vector<16xf32>
    %151 = vector.shape_cast %150 : vector<16xf32> to vector<16x1xf32>
    %152 = vector.broadcast %151 : vector<16x1xf32> to vector<16x16xf32>
    %153 = arith.divf %149, %152 : vector<16x16xf32>
    %154 = arith.truncf %153 : vector<16x16xf32> to vector<16x16xbf16>
    %cst_42 = arith.constant dense<0.000000e+00> : vector<16x8xf32>
    %155 = tpu.matmul %154, %141, %cst_42 {dimension_numbers = #tpu.dot_dimension_numbers<[1], [0], [0], [1], [0, 0, 1, 1], [], []>} : vector<16x16xbf16>, vector<16x8xbf16>, vector<16x8xf32> -> vector<16x8xf32>
    %156 = arith.truncf %155 : vector<16x8xf32> to vector<16x8xbf16>
    %157 = vector.extract_strided_slice %8 {offsets = [24, 0], sizes = [8, 32], strides = [1, 1]} : vector<32x32xf32> to vector<8x32xf32>
    %158 = arith.truncf %157 : vector<8x32xf32> to vector<8x32xbf16>
    %cst_43 = arith.constant dense<0.000000e+00> : vector<16x32xf32>
    %159 = tpu.matmul %156, %158, %cst_43 {dimension_numbers = #tpu.dot_dimension_numbers<[1], [0], [0], [1], [0, 0, 1, 1], [], []>} : vector<16x8xbf16>, vector<8x32xbf16>, vector<16x32xf32> -> vector<16x32xf32>
    %160 = arith.addf %87, %111 : vector<16x32xf32>
    %161 = arith.addf %135, %159 : vector<16x32xf32>
    %162 = arith.addf %160, %161 : vector<16x32xf32>
    %163 = vector.extract_strided_slice %4 {offsets = [3, 0], sizes = [1, 32], strides = [1, 1]} : vector<16x32xf32> to vector<1x32xf32>
    %164 = vector.broadcast %163 : vector<1x32xf32> to vector<16x32xf32>
    %165 = arith.addf %162, %164 : vector<16x32xf32>
    %166 = arith.addf %165, %0 : vector<16x32xf32>
    %167 = vector.extract_strided_slice %4 {offsets = [6, 0], sizes = [1, 32], strides = [1, 1]} : vector<16x32xf32> to vector<1x32xf32>
    %168 = vector.extract_strided_slice %4 {offsets = [7, 0], sizes = [1, 32], strides = [1, 1]} : vector<16x32xf32> to vector<1x32xf32>
    %cst_44 = arith.constant dense<0.000000e+00> : vector<16xf32>
    %169 = vector.multi_reduction <add>, %166, %cst_44 [1] : vector<16x32xf32> to vector<16xf32>
    %170 = vector.shape_cast %169 : vector<16xf32> to vector<16x1xf32>
    %cst_45 = arith.constant 3.200000e+01 : f32
    %171 = vector.broadcast %cst_45 : f32 to vector<16x1xf32>
    %172 = arith.divf %170, %171 : vector<16x1xf32>
    %173 = vector.broadcast %172 : vector<16x1xf32> to vector<16x32xf32>
    %174 = arith.subf %166, %173 : vector<16x32xf32>
    %175 = arith.mulf %174, %174 : vector<16x32xf32>
    %cst_46 = arith.constant dense<0.000000e+00> : vector<16xf32>
    %176 = vector.multi_reduction <add>, %175, %cst_46 [1] : vector<16x32xf32> to vector<16xf32>
    %177 = vector.shape_cast %176 : vector<16xf32> to vector<16x1xf32>
    %cst_47 = arith.constant 3.200000e+01 : f32
    %178 = vector.broadcast %cst_47 : f32 to vector<16x1xf32>
    %179 = arith.divf %177, %178 : vector<16x1xf32>
    %180 = vector.broadcast %172 : vector<16x1xf32> to vector<16x32xf32>
    %181 = arith.subf %166, %180 : vector<16x32xf32>
    %cst_48 = arith.constant 9.99999974E-6 : f32
    %182 = vector.broadcast %cst_48 : f32 to vector<16x1xf32>
    %183 = arith.addf %179, %182 : vector<16x1xf32>
    %184 = math.rsqrt %183 : vector<16x1xf32>
    %185 = vector.broadcast %184 : vector<16x1xf32> to vector<16x32xf32>
    %186 = arith.mulf %181, %185 : vector<16x32xf32>
    %187 = vector.broadcast %167 : vector<1x32xf32> to vector<16x32xf32>
    %188 = arith.mulf %186, %187 : vector<16x32xf32>
    %189 = vector.broadcast %168 : vector<1x32xf32> to vector<16x32xf32>
    %190 = arith.addf %188, %189 : vector<16x32xf32>
    %191 = arith.truncf %190 : vector<16x32xf32> to vector<16x32xbf16>
    %192 = arith.truncf %9 : vector<32x32xf32> to vector<32x32xbf16>
    %cst_49 = arith.constant dense<0.000000e+00> : vector<16x32xf32>
    %193 = tpu.matmul %191, %192, %cst_49 {dimension_numbers = #tpu.dot_dimension_numbers<[1], [0], [0], [1], [0, 0, 1, 1], [], []>} : vector<16x32xbf16>, vector<32x32xbf16>, vector<16x32xf32> -> vector<16x32xf32>
    %194 = vector.extract_strided_slice %4 {offsets = [4, 0], sizes = [1, 32], strides = [1, 1]} : vector<16x32xf32> to vector<1x32xf32>
    %195 = vector.broadcast %194 : vector<1x32xf32> to vector<16x32xf32>
    %196 = arith.addf %193, %195 : vector<16x32xf32>
    %cst_50 = arith.constant 0.000000e+00 : f32
    %197 = vector.broadcast %cst_50 : f32 to vector<16x32xf32>
    %198 = arith.maximumf %196, %197 : vector<16x32xf32>
    %199 = arith.truncf %198 : vector<16x32xf32> to vector<16x32xbf16>
    %200 = arith.truncf %10 : vector<32x32xf32> to vector<32x32xbf16>
    %cst_51 = arith.constant dense<0.000000e+00> : vector<16x32xf32>
    %201 = tpu.matmul %199, %200, %cst_51 {dimension_numbers = #tpu.dot_dimension_numbers<[1], [0], [0], [1], [0, 0, 1, 1], [], []>} : vector<16x32xbf16>, vector<32x32xbf16>, vector<16x32xf32> -> vector<16x32xf32>
    %202 = vector.extract_strided_slice %4 {offsets = [5, 0], sizes = [1, 32], strides = [1, 1]} : vector<16x32xf32> to vector<1x32xf32>
    %203 = vector.broadcast %202 : vector<1x32xf32> to vector<16x32xf32>
    %204 = arith.addf %201, %203 : vector<16x32xf32>
    %205 = arith.addf %204, %190 : vector<16x32xf32>
    %206 = vector.extract_strided_slice %4 {offsets = [8, 0], sizes = [1, 32], strides = [1, 1]} : vector<16x32xf32> to vector<1x32xf32>
    %207 = vector.extract_strided_slice %4 {offsets = [9, 0], sizes = [1, 32], strides = [1, 1]} : vector<16x32xf32> to vector<1x32xf32>
    %cst_52 = arith.constant dense<0.000000e+00> : vector<16xf32>
    %208 = vector.multi_reduction <add>, %205, %cst_52 [1] : vector<16x32xf32> to vector<16xf32>
    %209 = vector.shape_cast %208 : vector<16xf32> to vector<16x1xf32>
    %cst_53 = arith.constant 3.200000e+01 : f32
    %210 = vector.broadcast %cst_53 : f32 to vector<16x1xf32>
    %211 = arith.divf %209, %210 : vector<16x1xf32>
    %212 = vector.broadcast %211 : vector<16x1xf32> to vector<16x32xf32>
    %213 = arith.subf %205, %212 : vector<16x32xf32>
    %214 = arith.mulf %213, %213 : vector<16x32xf32>
    %cst_54 = arith.constant dense<0.000000e+00> : vector<16xf32>
    %215 = vector.multi_reduction <add>, %214, %cst_54 [1] : vector<16x32xf32> to vector<16xf32>
    %216 = vector.shape_cast %215 : vector<16xf32> to vector<16x1xf32>
    %cst_55 = arith.constant 3.200000e+01 : f32
    %217 = vector.broadcast %cst_55 : f32 to vector<16x1xf32>
    %218 = arith.divf %216, %217 : vector<16x1xf32>
    %219 = vector.broadcast %211 : vector<16x1xf32> to vector<16x32xf32>
    %220 = arith.subf %205, %219 : vector<16x32xf32>
    %cst_56 = arith.constant 9.99999974E-6 : f32
    %221 = vector.broadcast %cst_56 : f32 to vector<16x1xf32>
    %222 = arith.addf %218, %221 : vector<16x1xf32>
    %223 = math.rsqrt %222 : vector<16x1xf32>
    %224 = vector.broadcast %223 : vector<16x1xf32> to vector<16x32xf32>
    %225 = arith.mulf %220, %224 : vector<16x32xf32>
    %226 = vector.broadcast %206 : vector<1x32xf32> to vector<16x32xf32>
    %227 = arith.mulf %225, %226 : vector<16x32xf32>
    %228 = vector.broadcast %207 : vector<1x32xf32> to vector<16x32xf32>
    %229 = arith.addf %227, %228 : vector<16x32xf32>
    %c0_57 = arith.constant 0 : index
    %c0_58 = arith.constant 0 : index
    %230 = vector.load %arg6[%c0_57, %c0_58] : memref<16x32xf32, #tpu.memory_space<vmem>>, vector<16x32xf32>
    tpu.vector_store %arg6[%c0_57, %c0_58], %229 {strides = array<i32>} : memref<16x32xf32, #tpu.memory_space<vmem>>, vector<16x32xf32>,
    return
  }
  func.func @transform_0(%arg0: i32) -> (i32, i32) {
    %c0_i32 = arith.constant 0 : i32
    %c0_i32_0 = arith.constant 0 : i32
    %c0_i32_1 = arith.constant 0 : i32
    return %c0_i32, %c0_i32_0 : i32, i32
  }
  func.func @transform_1(%arg0: i32) -> (i32, i32) {
    %c0_i32 = arith.constant 0 : i32
    %c0_i32_0 = arith.constant 0 : i32
    %c0_i32_1 = arith.constant 0 : i32
    return %c0_i32, %c0_i32_0 : i32, i32
  }
  func.func @transform_2(%arg0: i32) -> (i32, i32) {
    %c0_i32 = arith.constant 0 : i32
    %c0_i32_0 = arith.constant 0 : i32
    %c0_i32_1 = arith.constant 0 : i32
    return %c0_i32, %c0_i32_0 : i32, i32
  }
  func.func @transform_3(%arg0: i32) -> (i32, i32) {
    %c0_i32 = arith.constant 0 : i32
    %c0_i32_0 = arith.constant 0 : i32
    %c0_i32_1 = arith.constant 0 : i32
    return %c0_i32, %c0_i32_0 : i32, i32
  }
  func.func @transform_4(%arg0: i32) -> (i32, i32) {
    %c0_i32 = arith.constant 0 : i32
    %c0_i32_0 = arith.constant 0 : i32
    %c0_i32_1 = arith.constant 0 : i32
    return %c0_i32, %c0_i32_0 : i32, i32
  }
  func.func @transform_5(%arg0: i32) -> (i32, i32) {
    %c0_i32 = arith.constant 0 : i32
    %c0_i32_0 = arith.constant 0 : i32
    %c0_i32_1 = arith.constant 0 : i32
    return %c0_i32, %c0_i32_0 : i32, i32
  }
}

</mosaic_0001>

<bundles_post_ra>
// kernel: transformer_block.1
= control target key start
LH: loop header
LB: loop body
LE: loop exit
PB: predicated region body
PF: predicated region fallthrough
CT: control target
= control target key end

     0   :  { %v1392_v3 = vmov 0.0   ;;  %vm1393_vm0 = vmmov 0   ;;  %s1746_s0 = inlined_call_operand.vmem [shape: f32[16,32], index: 0, kind: input, shape index: {}]   ;;  %s1747_s1 = inlined_call_operand.vmem [shape: f32[16,32], index: 1, kind: input, shape index: {}]   ;;  %s1748_s2 = inlined_call_operand.vmem [shape: f32[16,32], index: 2, kind: input, shape index: {}]   ;;  %s1749_s3 = inlined_call_operand.vmem [shape: f32[192,32], index: 3, kind: input, shape index: {}]   ;;  %s1750_s4 = inlined_call_operand.vmem [shape: f32[16,32], index: 4, kind: input, shape index: {}]   ;;  %s1751_s5 = inlined_call_operand.hbm [shape: f32[16,32], index: 5, kind: output, shape index: {}]  }
   0x1   :  { %v32_v0 = vld [vmem:[%s1749_s3 + $0x20] sm:$0xff]  ;;  %v33_v1 = vld [vmem:[%s1749_s3 + $0x28] sm:$0xff]  ;;  %v34_v2 = vld [vmem:[%s1749_s3 + $0x30] sm:$0xff]  ;;  %1216 = vmatprep.subr.bf16.mxu1 %v1392_v3  ;;  %1208 = vmatprep.subr.bf16.mxu0 %v1392_v3 }
   0x2   :  { %v107_v4 = vpack.c.bf16 %v33_v1, %v32_v0  ;;  %v35_v5 = vld [vmem:[%s1749_s3 + $0x38] sm:$0xff]  ;;  %v28_v6 = vld [vmem:[%s1749_s3] sm:$0xff]  ;;  %v29_v7 = vld [vmem:[%s1749_s3 + $0x8] sm:$0xff]  ;;  %1220 = vmatprep.mubr.msk.bf16.mxu1 %vm1393_vm0, %v1392_v3  ;;  %1212 = vmatprep.mubr.msk.bf16.mxu0 %vm1393_vm0, %v1392_v3 }
   0x3   :  { %v55_v8 = vpack.c.bf16 %v29_v7, %v28_v6  ;;  %v30_v9 = vld [vmem:[%s1749_s3 + $0x10] sm:$0xff]  ;;  %v108_v10 = vpack.c.bf16 %v35_v5, %v34_v2  ;;  %v24_v11 = vld [vmem:[%s1747_s1] sm:$0xff]  ;;  %v25_v12 = vld [vmem:[%s1747_s1 + $0x8] sm:$0xff] }
   0x4   :  { %1217 = vmatpush3.bf16.msra.mxu1 %v107_v4  ;;  %v31_v13 = vld [vmem:[%s1749_s3 + $0x18] sm:$0xff]  ;;  %v1470_v15 = vld [vmem:[%s1746_s0] sm:$0xff]  ;;  %v1475_v16 = vld [vmem:[%s1746_s0 + $0x8] sm:$0xff] }
   0x5   :  { %1218 = vmatprep.subr.bf16.mxu1 %v1392_v3  ;;  %1209 = vmatpush3.bf16.msra.mxu0 %v55_v8  ;;  %v56_v14 = vpack.c.bf16 %v31_v13, %v30_v9 }
   0x6   :  { %10 = vsyncpa [#allocation3], 0  ;;  %1210 = vmatprep.subr.bf16.mxu0 %v1392_v3  ;;  %v106_v17 = vpack.c.bf16 %v25_v12, %v24_v11  ;;  %vm61_vm1 = vcmask 261120   ;;  %v54_v18 = vpack.c.bf16 %v1475_v16, %v1470_v15  ;;  %v57_v19 = vlaneseq  ;;  %v1495_v23 = vld [vmem:[%s1750_s4] sm:$0xff]  ;;  %v37_v33 = vld [vmem:[%s1749_s3 + $0x48] sm:$0xff]  ;;  %s1394_s29 = smov 120  }
   0x7   :  { %v36_v32 = vld [vmem:[%s1749_s3 + $0x40] sm:$0xff]  ;;  %v38_v34 = vld [vmem:[%s1749_s3 + $0x50] sm:$0xff]  ;;  %v39_v40 = vld [vmem:[%s1749_s3 + $0x58] sm:$0xff]  ;;  %vm254_vm2 = vcmask 64512   ;;  %vm304_vm4 = vcmask 130048   ;;  %s1396_s30 = smov 104  }
   0x8   :  { %1219 = vmatpush3.bf16.msra.mxu1 %v108_v10  ;;  %v1488_v20 = vshrl.u32 %v57_v19, 7  ;;  %v158_v39 = vpack.c.bf16 %v37_v33, %v36_v32  ;;  %v159_v44 = vpack.c.bf16 %v39_v40, %v38_v34  ;;  %v26_v45 = vld [vmem:[%s1748_s2] sm:$0xff]  ;;  %v27_v46 = vld [vmem:[%s1748_s2 + $0x8] sm:$0xff]  ;;  %v212_v53 = vand.u32 127, %v57_v19  ;;  %s1395_s2 = smov 112  }
   0x9   :  { %1211 = vmatpush3.bf16.msra.mxu0 %v56_v14  ;;  %1232 = vmatprep.subr.bf16.mxu1 %v1392_v3  ;;  %v157_v49 = vpack.c.bf16 %v27_v46, %v26_v45  ;;  %vm505_vm6 = vcmask 1043456  }
   0xa   :  { %1224 = vmatprep.subr.bf16.mxu0 %v1392_v3  ;;  %v59_v21 = vsub.s32 0, %v1488_v20  ;;  %v111_v22 = vsub.s32 1, %v1488_v20  ;;  %v210_v54 = vadd.s32 8, %v1488_v20  ;;  %v162_v55 = vsub.s32 2, %v1488_v20 }
   0xb   :  { %1221 = vmatmul.mubr.msk.bf16.vlgmr.msra.gmra.mrb[0].mxu1 %vm61_vm1, %v106_v17  ;;  %v217_v56 = vand.u32 1, %v1488_v20  ;;  %v241_v57 = vand.u32 1, %v212_v53 }
   0xc   :  { %1213 = vmatmul.mubr.msk.bf16.vlgmr.msra.gmra.mrb[0].mxu0 %vm61_vm1, %v54_v18  ;;  %1234 = vmatprep.mubr.msk.bf16.mxu1 %vm1393_vm0, %v1392_v3  ;;  %v60_v24 = vrot.slane %v1495_v23, %v59_v21  ;;  %v112_v25 = vrot.slane %v1495_v23, %v111_v22  ;;  %v163_v58 = vrot.slane %v1495_v23, %v162_v55  ;;  %v224_v59 = vand.u32 1, %v210_v54 }
   0xd   :  { %1228 = vmatprep.mubr.msk.bf16.mxu0 %vm1393_vm0, %v1392_v3  ;;  %1225 = vmatpush3.bf16.msra.mxu0 %v158_v39  ;;  %vm1550_vm3 = vcmp.eq.s32.totalorder %v217_v56, %v241_v57 }
   0xe   :  { %1226 = vmatprep.subr.bf16.mxu0 %v1392_v3  ;;  %vm1554_vm5 = vcmp.eq.s32.totalorder %v224_v59, %v241_v57 }
  0x11   :  { %1227 = vmatpush3.bf16.msra.mxu0 %v159_v44 }
  0x12   :  { %1238 = vmatprep.subr.bf16.mxu0 %v1392_v3 }
  0x14   :  { %1229 = vmatmul.mubr.msk.bf16.vlgmr.msra.gmra.mrb[4].mxu0 %vm61_vm1, %v157_v49 }
  0x15   :  { %1240 = vmatprep.mubr.msk.bf16.mxu0 %vm1393_vm0, %v1392_v3 }
  0xde   :  { %v150_v26 = vpop.f32.mrb[0].mxu1 }
  0xdf   :  { %v1222_v27 = vpop.f32.mrb[1].mxu1  ;;  %v99_v28 = vpop.f32.mrb[0].mxu0  ;;  %v151_v35 = vadd.f32 %v150_v26, %v112_v25 }
  0xe0   :  { %v153_v29 = vpop.f32.mrb[2].mxu1  ;;  %v100_v30 = vadd.f32 %v99_v28, %v60_v24  ;;  %v1214_v31 = vpop.f32.mrb[1].mxu0 }
  0xe1   :  { %v154_v36 = vadd.f32 %v153_v29, %v112_v25  ;;  %v1223_v37 = vpop.f32.mrb[3].mxu1  ;;  %v102_v38 = vpop.f32.mrb[2].mxu0 }
  0xe2   :  { %v103_v41 = vadd.f32 %v102_v38, %v60_v24  ;;  %v1215_v42 = vpop.f32.mrb[3].mxu0 }
  0xe3   :  { %v1515_v43 = vpack.c.bf16 %v154_v36, %v151_v35 }
  0xe4   :  { %v1523_v47 = vpack.c.bf16 %v103_v41, %v100_v30 }
  0xe5   :  { %378 = vrot.lane.b32.xlu0 %v1515_v43, %s1394_s29  ;;  %v259_v48 = vsel %vm254_vm2, %v1515_v43, 0 }
  0xe6   :  { %1233 = vmatpush3.bf16.xpose.msra.mxu1 %v259_v48 }
  0xe7   :  { %1244 = vmatprep.subr.bf16.mxu1 %v1392_v3  ;;  %v201_v60 = vpop.f32.mrb[4].mxu0 }
  0xe8   :  { %v202_v62 = vadd.f32 %v201_v60, %v163_v58  ;;  %v1230_v63 = vpop.f32.mrb[5].mxu0 }
  0xe9   :  { %375 = vrot.lane.b32.xlu0 %v1523_v47, %s1394_s29  ;;  %v204_v0 = vpop.f32.mrb[6].mxu0 }
  0xea   :  { %v205_v4 = vadd.f32 %v204_v0, %v163_v58  ;;  %v1231_v5 = vpop.f32.mrb[7].mxu0 }
  0xec   :  { %v1561_v10 = vpack.c.bf16 %v205_v4, %v202_v62 }
  0xed   :  { %1235 = vmatmul.mubr.msk.bf16.vlgmr.msra.gmra.mrb[4].mxu1 %vm254_vm2, %v1523_v47 }
  0xee   :  { %1246 = vmatprep.mubr.msk.bf16.mxu1 %vm1393_vm0, %v1392_v3  ;;  %1239 = vmatpush3.bf16.msra.mxu0 %v1561_v10 }
  0xef   :  { %1250 = vmatprep.subr.bf16.mxu0 %v1392_v3 }
 0x157   :  { %v379_v50 = vpop.permute.xlu0 %378 }
 0x158   :  { %v384_v51 = vsel %vm254_vm2, %v379_v50, 0 }
 0x159   :  { %1245 = vmatpush3.bf16.xpose.msra.mxu1 %v384_v51 }
 0x15a   :  { %1256 = vmatprep.subr.bf16.mxu1 %v1392_v3 }
 0x15b   :  { %v376_v52 = vpop.permute.xlu0 %375 }
 0x160   :  { %1247 = vmatmul.mubr.msk.bf16.vlgmr.msra.gmra.mrb[8].mxu1 %vm254_vm2, %v376_v52 }
 0x161   :  { %1258 = vmatprep.mubr.msk.bf16.mxu1 %vm1393_vm0, %v1392_v3 }
 0x1c0   :  { %v295_v1 = vpop.f32.mrb[4].mxu1 }
 0x1c1   :  { %v302_v6 = vsel %vm1550_vm3, %v295_v1, -1e+30  ;;  %v1236_v7 = vpop.f32.mrb[5].mxu1 }
 0x1c2   :  { %v298_v8 = vpop.f32.mrb[6].mxu1  ;;  %v305_v9 = vsel %vm304_vm4, %v302_v6, -inf }
 0x1c3   :  { %v303_v11 = vsel %vm1554_vm5, %v298_v8, -1e+30  ;;  %306 = vmax.xlane.f32.xlu1 %v305_v9  ;;  %v1237_v12 = vpop.f32.mrb[7].mxu1  ;;  %v41_v8 = vld [vmem:[%s1749_s3 + $0x68] sm:$0xff] }
 0x1c4   :  { %v308_v13 = vsel %vm304_vm4, %v303_v11, -inf  ;;  %v501_v9 = vpack.c.bf16 %v41_v8, %v41_v8 }
 0x1c7   :  { %309 = vmax.xlane.f32.xlu1 %v308_v13 }
 0x233   :  { %v420_v14 = vpop.f32.mrb[8].mxu1 }
 0x234   :  { %v427_v17 = vsel %vm1550_vm3, %v420_v14, -1e+30  ;;  %v1248_v18 = vpop.f32.mrb[9].mxu1 }
 0x235   :  { %v423_v19 = vpop.f32.mrb[10].mxu1  ;;  %v429_v24 = vsel %vm304_vm4, %v427_v17, -inf }
 0x236   :  { %v428_v25 = vsel %vm1554_vm5, %v423_v19, -1e+30  ;;  %430 = vmax.xlane.f32.xlu0 %v429_v24  ;;  %v1249_v26 = vpop.f32.mrb[11].mxu1 }
 0x237   :  { %v432_v27 = vsel %vm304_vm4, %v428_v25, -inf }
 0x238   :  { %433 = vmax.xlane.f32.xlu1 %v432_v27 }
 0x249   :  { %453 = vrot.lane.b32.xlu1 %v1561_v10, %s1394_s29  ;;  %s1397_s29 = smov [#allocation2]  }
 0x24c   :  { %552 = vrot.lane.b32.xlu0 %v1515_v43, %s1395_s2 }
 0x250   :  { %v307_v28 = vpop.xlane.xlu1 %306 }
 0x251   :  { %v311_v29 = vsub.f32 %v302_v6, %v307_v28 }
 0x253   :  { %v313_v31 = vmul.f32 1.442695, %v311_v29 }
 0x254   :  { %v310_v30 = vpop.xlane.xlu1 %309 }
 0x255   :  { %v312_v32 = vsub.f32 %v303_v11, %v310_v30  ;;  %1328 = vpow2.f32 %v313_v31  ;;  %v507_v11 = vsel %vm505_vm6, %v501_v9, 0 }
 0x256   :  { %1257 = vmatpush3.bf16.msra.mxu1 %v507_v11 }
 0x257   :  { %v315_v33 = vmul.f32 1.442695, %v312_v32  ;;  %1268 = vmatprep.subr.bf16.mxu1 %v1392_v3 }
 0x259   :  { %1330 = vpow2.f32 %v315_v33 }
 0x25f   :  { %v1329_v34 = vpop.eup %1328 }
 0x260   :  { %v317_v35 = vsel %vm304_vm4, %v1329_v34, 0.0 }
 0x263   :  { %v1331_v36 = vpop.eup %1330 }
 0x264   :  { %v320_v37 = vsel %vm304_vm4, %v1331_v36, 0.0 }
 0x26d   :  { %318 = vadd.xlane.f32.xlu1 %v317_v35 }
 0x271   :  { %321 = vadd.xlane.f32.xlu1 %v320_v37 }
 0x2c3   :  { %v431_v38 = vpop.xlane.xlu0 %430 }
 0x2c4   :  { %v435_v39 = vsub.f32 %v427_v17, %v431_v38 }
 0x2c5   :  { %v434_v40 = vpop.xlane.xlu1 %433 }
 0x2c6   :  { %v437_v41 = vmul.f32 1.442695, %v435_v39  ;;  %v436_v42 = vsub.f32 %v428_v25, %v434_v40 }
 0x2c7   :  { %v553_v63 = vpop.permute.xlu0 %552 }
 0x2c8   :  { %1332 = vpow2.f32 %v437_v41  ;;  %v439_v44 = vmul.f32 1.442695, %v436_v42  ;;  %v558_v4 = vsel %vm254_vm2, %v553_v63, 0 }
 0x2c9   :  { %v454_v50 = vpop.permute.xlu1 %453 }
 0x2ca   :  { %1334 = vpow2.f32 %v439_v44 }
 0x2d2   :  { %v1333_v45 = vpop.eup %1332 }
 0x2d3   :  { %v441_v46 = vsel %vm304_vm4, %v1333_v45, 0.0 }
 0x2d4   :  { %v1335_v48 = vpop.eup %1334  ;;  %442 = vadd.xlane.f32.xlu1 %v441_v46 }
 0x2d5   :  { %v444_v49 = vsel %vm304_vm4, %v1335_v48, 0.0 }
 0x2d8   :  { %445 = vadd.xlane.f32.xlu1 %v444_v49 }
 0x2e9   :  { %550 = vrot.lane.b32.xlu1 %v1523_v47, %s1395_s2 }
 0x2ed   :  { %677 = vrot.lane.b32.xlu1 %v1515_v43, %s1396_s30 }
 0x2f1   :  { %675 = vrot.lane.b32.xlu1 %v1523_v47, %s1396_s30 }
 0x2fa   :  { %v319_v51 = vpop.xlane.xlu1 %318 }
 0x2fb   :  { %1336 = vrcp.f32 %v319_v51 }
 0x2fe   :  { %v322_v52 = vpop.xlane.xlu1 %321 }
 0x2ff   :  { %1338 = vrcp.f32 %v322_v52 }
 0x305   :  { %v1337_v53 = vpop.eup %1336 }
 0x306   :  { %v324_v55 = vmul.f32 %v1337_v53, %v1329_v34 }
 0x309   :  { %v1339_v54 = vpop.eup %1338 }
 0x30a   :  { %v326_v56 = vmul.f32 %v1339_v54, %v1331_v36 }
 0x30c   :  { %v327_v57 = vpack.c.bf16 %v326_v56, %v324_v55 }
 0x30e   :  { %1241 = vmatmul.mubr.msk.bf16.vlgmr.msra.gmra.mrb[8].mxu0 %vm304_vm4, %v327_v57 }
 0x30f   :  { %1251 = vmatpush3.bf16.msra.mxu0 %v454_v50  ;;  %1252 = vmatprep.mubr.msk.bf16.mxu0 %vm1393_vm0, %v1392_v3 }
 0x310   :  { %1262 = vmatprep.subr.bf16.mxu0 %v1392_v3 }
 0x361   :  { %v443_v43 = vpop.xlane.xlu1 %442 }
 0x362   :  { %1340 = vrcp.f32 %v443_v43 }
 0x365   :  { %v446_v47 = vpop.xlane.xlu1 %445 }
 0x366   :  { %1342 = vrcp.f32 %v446_v47 }
 0x369   :  { %v551_v1 = vpop.permute.xlu1 %550 }
 0x36c   :  { %v1341_v58 = vpop.eup %1340 }
 0x36d   :  { %v448_v60 = vmul.f32 %v1341_v58, %v1333_v45  ;;  %v678_v5 = vpop.permute.xlu1 %677 }
 0x36e   :  { %v683_v6 = vsel %vm254_vm2, %v678_v5, 0 }
 0x370   :  { %v1343_v59 = vpop.eup %1342 }
 0x371   :  { %v450_v62 = vmul.f32 %v1343_v59, %v1335_v48  ;;  %v676_v7 = vpop.permute.xlu1 %675 }
 0x373   :  { %v451_v0 = vpack.c.bf16 %v450_v62, %v448_v60 }
 0x375   :  { %1253 = vmatmul.mubr.msk.bf16.vlgmr.msra.gmra.mrb[12].mxu0 %vm304_vm4, %v451_v0 }
 0x376   :  { %1263 = vmatpush3.bf16.xpose.msra.mxu0 %v558_v4  ;;  %1264 = vmatprep.mubr.msk.bf16.mxu0 %vm1393_vm0, %v1392_v3 }
 0x377   :  { %1274 = vmatprep.subr.bf16.mxu0 %v1392_v3 }
 0x37d   :  { %1265 = vmatmul.mubr.msk.bf16.vlgmr.msra.gmra.mrb[16].mxu0 %vm254_vm2, %v551_v1 }
 0x37e   :  { %1275 = vmatpush3.bf16.xpose.msra.mxu0 %v683_v6  ;;  %1276 = vmatprep.mubr.msk.bf16.mxu0 %vm1393_vm0, %v1392_v3 }
 0x37f   :  { %1286 = vmatprep.subr.bf16.mxu0 %v1392_v3 }
 0x385   :  { %1277 = vmatmul.mubr.msk.bf16.vlgmr.msra.gmra.mrb[20].mxu0 %vm254_vm2, %v676_v7 }
 0x386   :  { %1288 = vmatprep.mubr.msk.bf16.mxu0 %vm1393_vm0, %v1392_v3 }
 0x3e1   :  { %v1610_v12 = vpop.f32.mrb[8].mxu0 }
 0x3e2   :  { %v1242_v13 = vpop.f32.mrb[9].mxu0 }
 0x3e3   :  { %v1612_v14 = vpop.f32.mrb[10].mxu0 }
 0x3e4   :  { %v372_v17 = vpack.c.bf16 %v1612_v14, %v1610_v12  ;;  %v1243_v18 = vpop.f32.mrb[11].mxu0  ;;  %v42_v14 = vld [vmem:[%s1749_s3 + $0x70] sm:$0xff] }
 0x448   :  { %v493_v19 = vpop.f32.mrb[12].mxu0 }
 0x449   :  { %v1254_v24 = vpop.f32.mrb[13].mxu0 }
 0x44a   :  { %v496_v25 = vpop.f32.mrb[14].mxu0  ;;  %v40_v24 = vld [vmem:[%s1749_s3 + $0x60] sm:$0xff] }
 0x44b   :  { %v500_v26 = vpack.c.bf16 %v496_v25, %v493_v19  ;;  %v1255_v27 = vpop.f32.mrb[15].mxu0 }
 0x44c   :  { %v373_v27 = vpack.c.bf16 %v40_v24, %v40_v24 }
 0x44d   :  { %1259 = vmatmul.mubr.msk.bf16.vlgmr.msra.gmra.mrb[12].mxu1 %vm254_vm2, %v500_v26 }
 0x44e   :  { %1270 = vmatprep.mubr.msk.bf16.mxu1 %vm1393_vm0, %v1392_v3 }
 0x450   :  { %v594_v28 = vpop.f32.mrb[16].mxu0 }
 0x451   :  { %v601_v29 = vsel %vm1550_vm3, %v594_v28, -1e+30  ;;  %v1266_v30 = vpop.f32.mrb[17].mxu0 }
 0x452   :  { %v597_v31 = vpop.f32.mrb[18].mxu0  ;;  %v603_v32 = vsel %vm304_vm4, %v601_v29, -inf }
 0x453   :  { %v602_v33 = vsel %vm1554_vm5, %v597_v31, -1e+30  ;;  %604 = vmax.xlane.f32.xlu1 %v603_v32  ;;  %v1267_v34 = vpop.f32.mrb[19].mxu0  ;;  %v851_v32 = vsel %vm505_vm6, %v373_v27, 0  ;;  %v45_v27 = vld [vmem:[%s1749_s3 + $0x88] sm:$0xff] }
 0x454   :  { %v606_v35 = vsel %vm304_vm4, %v602_v33, -inf }
 0x455   :  { %607 = vmax.xlane.f32.xlu0 %v606_v35 }
 0x458   :  { %v719_v36 = vpop.f32.mrb[20].mxu0 }
 0x459   :  { %v726_v37 = vsel %vm1550_vm3, %v719_v36, -1e+30  ;;  %v1278_v38 = vpop.f32.mrb[21].mxu0 }
 0x45a   :  { %v722_v39 = vpop.f32.mrb[22].mxu0  ;;  %v728_v40 = vsel %vm304_vm4, %v726_v37, -inf }
 0x45b   :  { %v727_v41 = vsel %vm1554_vm5, %v722_v39, -1e+30  ;;  %729 = vmax.xlane.f32.xlu0 %v728_v40  ;;  %v1279_v42 = vpop.f32.mrb[23].mxu0 }
 0x45c   :  { %v731_v44 = vsel %vm304_vm4, %v727_v41, -inf }
 0x45d   :  { %732 = vmax.xlane.f32.xlu1 %v731_v44 }
 0x4e0   :  { %v605_v45 = vpop.xlane.xlu1 %604 }
 0x4e1   :  { %v609_v46 = vsub.f32 %v601_v29, %v605_v45 }
 0x4e2   :  { %v608_v48 = vpop.xlane.xlu0 %607 }
 0x4e3   :  { %v611_v49 = vmul.f32 1.442695, %v609_v46  ;;  %v610_v50 = vsub.f32 %v602_v33, %v608_v48  ;;  %v43_v33 = vld [vmem:[%s1749_s3 + $0x78] sm:$0xff] }
 0x4e4   :  { %v799_v34 = vpack.c.bf16 %v43_v33, %v43_v33 }
 0x4e5   :  { %1344 = vpow2.f32 %v611_v49  ;;  %v613_v61 = vmul.f32 1.442695, %v610_v50 }
 0x4e6   :  { %v804_v35 = vsel %vm505_vm6, %v799_v34, 0 }
 0x4e7   :  { %1346 = vpow2.f32 %v613_v61  ;;  %1287 = vmatpush3.bf16.msra.mxu0 %v804_v35 }
 0x4e8   :  { %v730_v51 = vpop.xlane.xlu0 %729  ;;  %1298 = vmatprep.subr.bf16.mxu0 %v1392_v3 }
 0x4e9   :  { %v734_v52 = vsub.f32 %v726_v37, %v730_v51 }
 0x4ea   :  { %v733_v53 = vpop.xlane.xlu1 %732 }
 0x4eb   :  { %v736_v54 = vmul.f32 1.442695, %v734_v52  ;;  %v735_v55 = vsub.f32 %v727_v41, %v733_v53 }
 0x4ed   :  { %1348 = vpow2.f32 %v736_v54  ;;  %v738_v2 = vmul.f32 1.442695, %v735_v55 }
 0x4ef   :  { %v1345_v56 = vpop.eup %1344  ;;  %1350 = vpow2.f32 %v738_v2 }
 0x4f0   :  { %v615_v57 = vsel %vm304_vm4, %v1345_v56, 0.0 }
 0x4f1   :  { %v1347_v43 = vpop.eup %1346  ;;  %616 = vadd.xlane.f32.xlu0 %v615_v57 }
 0x4f2   :  { %v618_v47 = vsel %vm304_vm4, %v1347_v43, 0.0 }
 0x4f3   :  { %619 = vadd.xlane.f32.xlu1 %v618_v47 }
 0x4f7   :  { %v1349_v58 = vpop.eup %1348 }
 0x4f8   :  { %v740_v59 = vsel %vm304_vm4, %v1349_v58, 0.0 }
 0x4f9   :  { %v1351_v60 = vpop.eup %1350  ;;  %741 = vadd.xlane.f32.xlu0 %v740_v59 }
 0x4fa   :  { %v743_v62 = vsel %vm304_vm4, %v1351_v60, 0.0 }
 0x4fb   :  { %744 = vadd.xlane.f32.xlu1 %v743_v62 }
 0x50c   :  { %751 = vrot.lane.b32.xlu1 %v1561_v10, %s1396_s30 }
 0x50f   :  { %626 = vrot.lane.b32.xlu0 %v1561_v10, %s1395_s2  ;;  %s1141_s2 = sshll.u32 %s1397_s29, 4  ;;  %s1142_s2 = int_to_ptr.vmem [resolvable:$true] %s1141_s2 }
 0x510   :  { %p1373_p1 = scmp.lt.s32.totalorder %s1142_s2, %s1142_s2 }
 0x520   :  { %v543_v63 = vpop.f32.mrb[12].mxu1 }
 0x521   :  { %v1260_v0 = vpop.f32.mrb[13].mxu1 }
 0x522   :  { %v1639_v1 = vpop.f32.mrb[14].mxu1 }
 0x523   :  { %v1261_v4 = vpop.f32.mrb[15].mxu1 }
 0x57e   :  { %v617_v5 = vpop.xlane.xlu0 %616 }
 0x57f   :  { %1352 = vrcp.f32 %v617_v5 }
 0x580   :  { %v620_v6 = vpop.xlane.xlu1 %619 }
 0x581   :  { %1354 = vrcp.f32 %v620_v6 }
 0x586   :  { %v742_v7 = vpop.xlane.xlu0 %741 }
 0x587   :  { %1356 = vrcp.f32 %v742_v7 }
 0x588   :  { %v745_v8 = vpop.xlane.xlu1 %744 }
 0x589   :  { %v1353_v9 = vpop.eup %1352  ;;  %1358 = vrcp.f32 %v745_v8 }
 0x58a   :  { %v627_v11 = vpop.permute.xlu0 %626  ;;  %v622_v18 = vmul.f32 %v1353_v9, %v1345_v56  ;;  %v945_v56 = vsub.s32 3, %v1488_v20 }
 0x58b   :  { %v1355_v13 = vpop.eup %1354  ;;  %1269 = vmatpush3.bf16.msra.mxu1 %v627_v11 }
 0x58c   :  { %v624_v19 = vmul.f32 %v1355_v13, %v1347_v43  ;;  %1280 = vmatprep.subr.bf16.mxu1 %v1392_v3  ;;  %v752_v25 = vpop.permute.xlu1 %751 }
 0x58e   :  { %v625_v10 = vpack.c.bf16 %v624_v19, %v622_v18 }
 0x590   :  { %1271 = vmatmul.mubr.msk.bf16.vlgmr.msra.gmra.mrb[16].mxu1 %vm304_vm4, %v625_v10 }
 0x591   :  { %v1357_v26 = vpop.eup %1356  ;;  %1281 = vmatpush3.bf16.msra.mxu1 %v752_v25  ;;  %1282 = vmatprep.mubr.msk.bf16.mxu1 %vm1393_vm0, %v1392_v3 }
 0x592   :  { %1292 = vmatprep.subr.bf16.mxu1 %v1392_v3  ;;  %v747_v29 = vmul.f32 %v1357_v26, %v1349_v58  ;;  %v946_v58 = vrot.slane %v1495_v23, %v945_v56 }
 0x593   :  { %v1359_v28 = vpop.eup %1358 }
 0x594   :  { %v749_v30 = vmul.f32 %v1359_v28, %v1351_v60 }
 0x596   :  { %v750_v31 = vpack.c.bf16 %v749_v30, %v747_v29  ;;  %v46_v29 = vld [vmem:[%s1749_s3 + $0x90] sm:$0xff]  ;;  %v47_v30 = vld [vmem:[%s1749_s3 + $0x98] sm:$0xff] }
 0x598   :  { %1283 = vmatmul.mubr.msk.bf16.vlgmr.msra.gmra.mrb[20].mxu1 %vm304_vm4, %v750_v31  ;;  %v992_v31 = vpack.c.bf16 %v47_v30, %v46_v29 }
 0x599   :  { %1293 = vmatpush3.bf16.msra.mxu1 %v851_v32  ;;  %1294 = vmatprep.mubr.msk.bf16.mxu1 %vm1393_vm0, %v1392_v3 }
 0x59a   :  { %1304 = vmatprep.subr.bf16.mxu1 %v1392_v3 }
 0x5a0   :  { %1295 = vmatmul.mubr.msk.bf16.vlgmr.msra.gmra.mrb[24].mxu1 %vm254_vm2, %v372_v17  ;;  %v674_v17 = vpack.c.bf16 %v42_v14, %v42_v14 }
 0x5a1   :  { %1308 = vmatprep.mubr.msk.bf16.mxu1 %vm1393_vm0, %v1392_v3 }
 0x5a2   :  { %v898_v46 = vsel %vm505_vm6, %v674_v17, 0 }
 0x663   :  { %v666_v36 = vpop.f32.mrb[16].mxu1 }
 0x664   :  { %v1272_v37 = vpop.f32.mrb[17].mxu1 }
 0x665   :  { %v669_v38 = vpop.f32.mrb[18].mxu1 }
 0x666   :  { %v673_v39 = vpack.c.bf16 %v669_v38, %v666_v36  ;;  %v1273_v12 = vpop.f32.mrb[19].mxu1  ;;  %v980_v38 = vsub.s32 6, %v1488_v20 }
 0x667   :  { %v986_v12 = vsub.s32 7, %v1488_v20 }
 0x66b   :  { %v791_v40 = vpop.f32.mrb[20].mxu1 }
 0x66c   :  { %v1284_v41 = vpop.f32.mrb[21].mxu1 }
 0x66d   :  { %v794_v42 = vpop.f32.mrb[22].mxu1 }
 0x66e   :  { %v798_v44 = vpack.c.bf16 %v794_v42, %v791_v40  ;;  %v1285_v45 = vpop.f32.mrb[23].mxu1 }
 0x670   :  { %1289 = vmatmul.mubr.msk.bf16.vlgmr.msra.gmra.mrb[24].mxu0 %vm254_vm2, %v798_v44  ;;  %v987_v44 = vrot.slane %v1495_v23, %v986_v12 }
 0x671   :  { %1299 = vmatpush3.bf16.msra.mxu0 %v898_v46  ;;  %1300 = vmatprep.mubr.msk.bf16.mxu0 %vm1393_vm0, %v1392_v3 }
 0x672   :  { %1312 = vmatprep.subr.bf16.mxu0 %v1392_v3 }
 0x673   :  { %v887_v48 = vpop.f32.mrb[24].mxu1 }
 0x674   :  { %v888_v49 = vadd.f32 %v887_v48, %v543_v63  ;;  %v1296_v50 = vpop.f32.mrb[25].mxu1 }
 0x675   :  { %v890_v61 = vpop.f32.mrb[26].mxu1  ;;  %v48_v50 = vld [vmem:[%s1749_s3 + $0xa0] sm:$0xff] }
 0x676   :  { %v891_v51 = vadd.f32 %v890_v61, %v1639_v1  ;;  %v1297_v52 = vpop.f32.mrb[27].mxu1  ;;  %v49_v61 = vld [vmem:[%s1749_s3 + $0xa8] sm:$0xff] }
 0x677   :  { %v50_v52 = vld [vmem:[%s1749_s3 + $0xb0] sm:$0xff] }
 0x678   :  { %1301 = vmatmul.mubr.msk.bf16.vlgmr.msra.gmra.mrb[28].mxu0 %vm254_vm2, %v673_v39  ;;  %v981_v39 = vrot.slane %v1495_v23, %v980_v38 }
 0x679   :  { %1316 = vmatprep.mubr.msk.bf16.mxu0 %vm1393_vm0, %v1392_v3 }
 0x743   :  { %v840_v53 = vpop.f32.mrb[24].mxu0 }
 0x744   :  { %v1290_v54 = vpop.f32.mrb[25].mxu0 }
 0x745   :  { %v843_v55 = vpop.f32.mrb[26].mxu0 }
 0x746   :  { %v1291_v2 = vpop.f32.mrb[27].mxu0 }
 0x74b   :  { %v934_v57 = vpop.f32.mrb[28].mxu0 }
 0x74c   :  { %v935_v43 = vadd.f32 %v934_v57, %v840_v53  ;;  %v1302_v47 = vpop.f32.mrb[29].mxu0  ;;  %v51_v53 = vld [vmem:[%s1749_s3 + $0xb8] sm:$0xff] }
 0x74d   :  { %v937_v59 = vpop.f32.mrb[30].mxu0  ;;  %v1045_v54 = vpack.c.bf16 %v51_v53, %v50_v52 }
 0x74e   :  { %v941_v60 = vadd.f32 %v935_v43, %v888_v49  ;;  %v938_v62 = vadd.f32 %v937_v59, %v843_v55  ;;  %v1303_v63 = vpop.f32.mrb[31].mxu0  ;;  %v995_v55 = vsub.s32 4, %v1488_v20 }
 0x74f   :  { %v1048_v63 = vsub.s32 5, %v1488_v20 }
 0x750   :  { %v942_v0 = vadd.f32 %v938_v62, %v891_v51  ;;  %v947_v1 = vadd.f32 %v946_v58, %v941_v60  ;;  %v1044_v51 = vpack.c.bf16 %v49_v61, %v48_v50  ;;  %v996_v2 = vrot.slane %v1495_v23, %v995_v55 }
 0x752   :  { %v949_v4 = vadd.f32 %v947_v1, %v1470_v15  ;;  %v948_v5 = vadd.f32 %v946_v58, %v942_v0  ;;  %1313 = vmatpush3.bf16.msra.mxu0 %v1044_v51  ;;  %v1049_v0 = vrot.slane %v1495_v23, %v1048_v63 }
 0x753   :  { %1314 = vmatprep.subr.bf16.mxu0 %v1392_v3 }
 0x754   :  { %v951_v6 = vsel %vm61_vm1, %v949_v4, 0.0  ;;  %v950_v7 = vadd.f32 %v948_v5, %v1475_v16  ;;  %v44_v16 = vld [vmem:[%s1749_s3 + $0x80] sm:$0xff] }
 0x755   :  { %952 = vadd.xlane.f32.xlu1 %v951_v6  ;;  %v991_v28 = vpack.c.bf16 %v45_v27, %v44_v16 }
 0x756   :  { %v954_v8 = vsel %vm61_vm1, %v950_v7, 0.0  ;;  %1315 = vmatpush3.bf16.msra.mxu0 %v1045_v54 }
 0x757   :  { %955 = vadd.xlane.f32.xlu0 %v954_v8  ;;  %1305 = vmatpush3.bf16.msra.mxu1 %v991_v28 }
 0x758   :  { %1306 = vmatprep.subr.bf16.mxu1 %v1392_v3 }
 0x75b   :  { %1307 = vmatpush3.bf16.msra.mxu1 %v992_v31 }
 0x7e2   :  { %v953_v9 = vpop.xlane.xlu1 %952 }
 0x7e3   :  { %v958_v11 = vmul.f32 0.03125, %v953_v9 }
 0x7e4   :  { %v956_v13 = vpop.xlane.xlu0 %955 }
 0x7e5   :  { %v960_v18 = vsub.f32 %v949_v4, %v958_v11  ;;  %v959_v19 = vmul.f32 0.03125, %v956_v13 }
 0x7e7   :  { %v961_v10 = vsub.f32 %v950_v7, %v959_v19  ;;  %v962_v24 = vmul.f32 %v960_v18, %v960_v18 }
 0x7e9   :  { %v964_v25 = vsel %vm61_vm1, %v962_v24, 0.0  ;;  %v963_v26 = vmul.f32 %v961_v10, %v961_v10 }
 0x7ea   :  { %965 = vadd.xlane.f32.xlu0 %v964_v25 }
 0x7eb   :  { %v967_v15 = vsel %vm61_vm1, %v963_v26, 0.0 }
 0x7ec   :  { %968 = vadd.xlane.f32.xlu1 %v967_v15 }
 0x877   :  { %v966_v32 = vpop.xlane.xlu0 %965 }
 0x878   :  { %v970_v33 = vmul.f32 0.03125, %v966_v32 }
 0x879   :  { %v969_v34 = vpop.xlane.xlu1 %968 }
 0x87a   :  { %v972_v35 = vadd.f32 1e-05, %v970_v33  ;;  %v971_v36 = vmul.f32 0.03125, %v969_v34 }
 0x87c   :  { %1360 = vrsqrt.f32 %v972_v35  ;;  %v973_v37 = vadd.f32 1e-05, %v971_v36  ;;  %v53_v35 = vld [vmem:[%s1750_s4 + $0x8] sm:$0xff]  ;;  %s1368_s4 = scalar_lea.vmem %s1142_s2, 256 }
 0x87d   :  { %v1125_v36 = vrot.slane %v53_v35, %v59_v21  ;;  %v1131_v38 = vrot.slane %v53_v35, %v111_v22  ;;  %p1369_p0 = scmp.ne.s32.totalorder %s1142_s2, %s1368_s4  ;;  %p1374_p2 = scmp.lt.s32.totalorder %s1368_s4, %s1368_s4 }
 0x87e   :  { %1362 = vrsqrt.f32 %v973_v37 }
 0x87f   :  { %p1375_p3 = por %p1374_p2, %p1373_p1 }
 0x881   :  { %p1376_p4 = pnand %p1375_p3, %p1369_p0 }
 0x886   :  { %v1361_v14 = vpop.eup %1360 }
 0x887   :  { %v976_v17 = vmul.f32 %v1361_v14, %v960_v18 }
 0x888   :  { %v1363_v40 = vpop.eup %1362 }
 0x889   :  { %v982_v41 = vmul.f32 %v981_v39, %v976_v17  ;;  %v977_v42 = vmul.f32 %v1363_v40, %v961_v10 }
 0x88b   :  { %v983_v45 = vmul.f32 %v981_v39, %v977_v42  ;;  %v988_v46 = vadd.f32 %v987_v44, %v982_v41 }
 0x88d   :  { %v989_v48 = vadd.f32 %v987_v44, %v983_v45 }
 0x88f   :  { %v990_v49 = vpack.c.bf16 %v989_v48, %v988_v46 }
 0x891   :  { %1309 = vmatmul.mubr.msk.bf16.vlgmr.msra.gmra.mrb[28].mxu1 %vm61_vm1, %v990_v49 }
 0x964   :  { %v1034_v56 = vpop.f32.mrb[28].mxu1 }
 0x965   :  { %v1035_v57 = vadd.f32 %v1034_v56, %v996_v2  ;;  %v1310_v43 = vpop.f32.mrb[29].mxu1 }
 0x966   :  { %v1037_v47 = vpop.f32.mrb[30].mxu1 }
 0x967   :  { %v1038_v58 = vadd.f32 %v1037_v47, %v996_v2  ;;  %v1311_v3 = vpop.f32.mrb[31].mxu1  ;;  %v1041_v59 = vmax.f32 %v1035_v57, 0.0 }
 0x969   :  { %v1042_v60 = vmax.f32 %v1038_v58, 0.0 }
 0x96b   :  { %v1043_v62 = vpack.c.bf16 %v1042_v60, %v1041_v59 }
 0x96d   :  { %1317 = vmatmul.mubr.msk.bf16.vlgmr.msra.gmra.mrb[32].mxu0 %vm61_vm1, %v1043_v62 }
 0xa40   :  { %v1087_v1 = vpop.f32.mrb[32].mxu0 }
 0xa41   :  { %v1088_v4 = vadd.f32 %v1087_v1, %v1049_v0  ;;  %v1318_v5 = vpop.f32.mrb[33].mxu0 }
 0xa42   :  { %v1090_v6 = vpop.f32.mrb[34].mxu0 }
 0xa43   :  { %v1091_v7 = vadd.f32 %v1090_v6, %v1049_v0  ;;  %v1319_v8 = vpop.f32.mrb[35].mxu0  ;;  %v1094_v9 = vadd.f32 %v1088_v4, %v988_v46 }
 0xa45   :  { %v1096_v11 = vsel %vm61_vm1, %v1094_v9, 0.0  ;;  %v1095_v13 = vadd.f32 %v1091_v7, %v989_v48 }
 0xa46   :  { %1097 = vadd.xlane.f32.xlu0 %v1096_v11 }
 0xa47   :  { %v1099_v18 = vsel %vm61_vm1, %v1095_v13, 0.0 }
 0xa48   :  { %1100 = vadd.xlane.f32.xlu1 %v1099_v18 }
 0xad3   :  { %v1098_v19 = vpop.xlane.xlu0 %1097 }
 0xad4   :  { %v1102_v10 = vmul.f32 0.03125, %v1098_v19 }
 0xad5   :  { %v1101_v24 = vpop.xlane.xlu1 %1100 }
 0xad6   :  { %v1104_v25 = vsub.f32 %v1094_v9, %v1102_v10  ;;  %v1103_v26 = vmul.f32 0.03125, %v1101_v24 }
 0xad8   :  { %v1105_v23 = vsub.f32 %v1095_v13, %v1103_v26  ;;  %v1106_v15 = vmul.f32 %v1104_v25, %v1104_v25 }
 0xada   :  { %v1108_v16 = vsel %vm61_vm1, %v1106_v15, 0.0  ;;  %v1107_v27 = vmul.f32 %v1105_v23, %v1105_v23 }
 0xadb   :  { %1109 = vadd.xlane.f32.xlu0 %v1108_v16 }
 0xadc   :  { %v1111_v28 = vsel %vm61_vm1, %v1107_v27, 0.0 }
 0xadd   :  { %1112 = vadd.xlane.f32.xlu1 %v1111_v28 }
 0xb68   :  { %v1110_v29 = vpop.xlane.xlu0 %1109 }
 0xb69   :  { %v1114_v30 = vmul.f32 0.03125, %v1110_v29 }
 0xb6a   :  { %v1113_v31 = vpop.xlane.xlu1 %1112 }
 0xb6b   :  { %v1116_v32 = vadd.f32 1e-05, %v1114_v30  ;;  %v1115_v33 = vmul.f32 0.03125, %v1113_v31 }
 0xb6d   :  { %1364 = vrsqrt.f32 %v1116_v32  ;;  %v1117_v34 = vadd.f32 1e-05, %v1115_v33 }
 0xb6f   :  { %1366 = vrsqrt.f32 %v1117_v34 }
 0xb77   :  { %v1365_v37 = vpop.eup %1364 }
 0xb78   :  { %v1120_v39 = vmul.f32 %v1365_v37, %v1104_v25 }
 0xb79   :  { %v1367_v12 = vpop.eup %1366 }
 0xb7a   :  { %v1121_v14 = vmul.f32 %v1367_v12, %v1105_v23  ;;  %v1126_v17 = vmul.f32 %v1125_v36, %v1120_v39 }
 0xb7c   :  { %v1127_v40 = vmul.f32 %v1125_v36, %v1121_v14  ;;  %v1132_v41 = vadd.f32 %v1131_v38, %v1126_v17 }
 0xb7e   :  { %v1133_v42 = vadd.f32 %v1131_v38, %v1127_v40  ;;  %1134 = vst.msk [vmem:[#allocation2] sm:$0xff] %vm61_vm1, %v1132_v41 }
 0xb80   :  { %1135 = vst.msk [vmem:[#allocation2 + $0x8] sm:$0xff] %vm61_vm1, %v1133_v42 }
 0xb81   :  { %1379 = shalt.err (!%p1376_p4)
}
 0xb82   :  { %s1380_s7 = scalar_lea.hbm %s1751_s5, 256 }
 0xb83   :  { %p1381_p5 = scmp.ne.s32.totalorder %s1751_s5, %s1380_s7  ;;  %p1384_p6 = scmp.lt.u32.totalorder %s1380_s7, %s1751_s5 }
 0xb85   :  { %p1386_p7 = pnand %p1384_p6, %p1381_p5 }
 0xb87   :  { %1389 = shalt.err (!%p1386_p7)
}
 0xb88   :  { %s1398_s12 = smov 128   ;;  %s1399_s13 = smov 8  }
 0xb89   :  { %1147 = dma.vmem_to_hbm [thread:$0]  %s1142_s2, 256, %s1751_s5, [#allocation3], %s1398_s12, %s1398_s12, %s1399_s13  }
 0xb8a   :  { %1390 = dma.done.wait [#allocation3], 256  }
 0xb8b   :  { %1391 = vsyncadd [#allocation3], 4294967040 }
 0xb8c   :  { %1151 = vsyncpa [#allocation3], 1 }

</bundles_post_ra>
